<compile_context>
chip_gen: v6e
topology: v6e:2x2x1
jax: 0.10.0
libtpu: 0.0.40
codegen_flags: <defaults>
</compile_context>

<pallas_src>
import numpy as np
import jax
import jax.numpy as jnp
from jax.experimental import pallas as pl
from jax.experimental.pallas import tpu as pltpu

EPS = 1e-5


def _round_up(x, m):
    return ((x + m - 1) // m) * m


def _pad_dim(n):
    """Lane-dense padding: 128 for narrow dims, 256-aligned for wide dims so
    v6e/v7x present full 256x256 MXU tiles (128 keeps narrow layers cheap and
    matches v5e's 128x128 MXU)."""
    m = 128 if n <= 128 else 256
    return _round_up(n, m)


# ----------------------------- Kernel: fused MLP ------------------------------
def make_mlp_kernel(in_widths, out_widths):
    """in_widths/out_widths: padded (lane-dense) input/output width of every
    layer; ReLU on all but the last layer."""
    n_layers = len(out_widths)

    def kernel(x_ref, w_ref, b_ref, o_ref):
        h = x_ref[...]                                     # (tile_b, K0p) f32
        for i in range(n_layers):
            kin, kout = in_widths[i], out_widths[i]
            w = w_ref[i, :kin, :kout]                      # bf16, static slice
            h = jnp.dot(h.astype(jnp.bfloat16), w,
                        preferred_element_type=jnp.float32)
            h = h + b_ref[i:i + 1, :kout]                  # f32 bias (1, kout)
            if i < n_layers - 1:
                h = jnp.maximum(h, 0.0)                    # ReLU, hidden only
        o_ref[...] = h

    return kernel


def pallas_mlp(x_flat, w_pack, bias_pack, in_widths, out_widths, *, tile_b,
               vmem_limit_bytes=None, cost_estimate=None):
    Bp, K0p = x_flat.shape
    Op = out_widths[-1]
    grid = (Bp // tile_b,)
    return pl.pallas_call(
        make_mlp_kernel(tuple(in_widths), tuple(out_widths)),
        out_shape=jax.ShapeDtypeStruct((Bp, Op), jnp.float32),
        grid=grid,
        in_specs=[
            pl.BlockSpec((tile_b, K0p), lambda i: (i, 0)),          # x tile
            pl.BlockSpec(w_pack.shape, lambda i: (0, 0, 0)),        # all weights
            pl.BlockSpec(bias_pack.shape, lambda i: (0, 0)),        # all biases
        ],
        out_specs=pl.BlockSpec((tile_b, Op), lambda i: (i, 0)),
        compiler_params=pltpu.CompilerParams(
            dimension_semantics=("parallel",),
            vmem_limit_bytes=vmem_limit_bytes),
        cost_estimate=cost_estimate,
    )(x_flat, w_pack, bias_pack)


# ----------------------------- Glue: constant folding --------------------------
def _bn_fold(gamma, beta, rmean, rvar):
    scale = gamma / jnp.sqrt(rvar + EPS)
    shift = beta - rmean * scale
    return scale, shift


def fold_params(P, C, H):
    """Fold every eval-mode BN into the adjacent linear map and fuse
    bn0 + 1x1 conv + flatten + bn1 + first Linear into one affine over C*H."""
    Fn = P["conv_w"].shape[0]
    s0, t0 = _bn_fold(P["bn0_gamma"], P["bn0_beta"], P["bn0_rmean"], P["bn0_rvar"])

    hidden = P["hidden"]
    l0 = hidden[0]
    s1, t1 = _bn_fold(l0["gamma"], l0["beta"], l0["rmean"], l0["rvar"])
    W1, b1 = l0["w"], l0["b"]                            # (n1, Fn*C), (n1,)
    n1 = W1.shape[0]
    # feat[b, f*C+c] = s0[c]*(conv_w[f,:] . x[b,c,:]) + t0[c]*sum_h conv_w[f,h] + conv_b[f]
    W1s = (W1 * s1[None, :]).reshape(n1, Fn, C)
    A = jnp.einsum("nfc,fh,c->nch", W1s, P["conv_w"], s0).reshape(n1, C * H)
    wsum = P["conv_w"].sum(axis=1)                       # (Fn,)
    feat_const = (t0[None, :] * wsum[:, None] + P["conv_b"][:, None]).reshape(Fn * C)
    d = b1 + W1 @ (s1 * feat_const + t1)

    Ws, bs = [A], [d]
    for lyr in hidden[1:]:
        s, t = _bn_fold(lyr["gamma"], lyr["beta"], lyr["rmean"], lyr["rvar"])
        W, b = lyr["w"], lyr["b"]
        Ws.append(W * s[None, :])
        bs.append(b + W @ t)
    so, to = _bn_fold(P["bnout_gamma"], P["bnout_beta"],
                      P["bnout_rmean"], P["bnout_rvar"])
    Wo, bo = P["fcout_w"], P["fcout_b"]
    Ws.append(Wo * so[None, :])
    bs.append(bo + Wo @ to)
    return Ws, bs


# ----------------------------- Tile selection ----------------------------------
def _pick_tile(B, K0p, Op, resident_bytes):
    """Batch tile: multiple of 8, up to 512 rows (≈85% of HBM roofline),
    >=2 grid steps once B>=16 (keeps v7x's second TensorCore busy), shrunk to
    fit a conservative VMEM budget (safe on v7x's 64 MiB physical VMEM)."""
    Bp8 = _round_up(max(B, 1), 8)
    tile = Bp8 if Bp8 < 16 else _round_up((Bp8 + 1) // 2, 8)
    tile = min(tile, 512)
    budget = 40 << 20
    while tile > 8 and resident_bytes + 2 * tile * (K0p + Op) * 4 > budget:
        tile = _round_up(tile // 2, 8)
    tile = max(tile, 8)
    return tile, _round_up(B, tile)


# ----------------------------- Wrapper ------------------------------------------
def tcn_forward(x, P):
    B, C, H = x.shape
    O = P["fcout_w"].shape[0]
    Ws, bs = fold_params(P, C, H)
    L = len(Ws)

    # Lane-dense padded widths for every layer boundary.
    K0 = C * H
    K0p = _pad_dim(K0)
    in_widths, out_widths = [], []
    k_in = K0p
    for W in Ws:
        k_out = _pad_dim(W.shape[0])
        in_widths.append(k_in)
        out_widths.append(k_out)
        k_in = k_out
    Kmax, Nmax = max(in_widths), max(out_widths)
    Op = out_widths[-1]

    # Pack all transposed weights (bf16) and biases (f32) into single arrays:
    # one DMA descriptor each, single resident VMEM buffer for the whole chain.
    w_pack = jnp.zeros((L, Kmax, Nmax), jnp.bfloat16)
    bias_pack = jnp.zeros((L, Nmax), jnp.float32)
    for i, (W, b) in enumerate(zip(Ws, bs)):
        n_out, n_in = W.shape
        w_pack = w_pack.at[i, :n_in, :n_out].set(W.T.astype(jnp.bfloat16))
        bias_pack = bias_pack.at[i, :n_out].set(b)

    # VMEM-resident bytes (x2: default double buffering of grid-invariant refs).
    resident = 2 * (L * Kmax * Nmax * 2 + L * Nmax * 4)
    tile_b, Bp = _pick_tile(B, K0p, Op, resident)

    footprint = resident + 2 * tile_b * (K0p + Op) * 4 + (2 << 20)
    vmem_limit = int(min(footprint * 1.25, 48 << 20)) if footprint > (16 << 20) else None

    flops = 2 * Bp * sum(ki * ko for ki, ko in zip(in_widths, out_widths))
    bytes_accessed = (Bp * K0p * 4 + L * Kmax * Nmax * 2
                      + L * Nmax * 4 + Bp * Op * 4)
    cost = pl.CostEstimate(flops=flops, transcendentals=0,
                           bytes_accessed=bytes_accessed)

    # Contiguous reshape -> (B, C*H); flatten order lives in the folded weights.
    x_flat = x.reshape(B, K0)
    if (Bp, K0p) != (B, K0):          # skip the extra HBM pass when aligned
        x_flat = jnp.pad(x_flat, ((0, Bp - B), (0, K0p - K0)))

    out = pallas_mlp(x_flat, w_pack, bias_pack, in_widths, out_widths,
                     tile_b=tile_b, vmem_limit_bytes=vmem_limit,
                     cost_estimate=cost)
    return out[:B, :O]


# ----------------------------- Pure-JAX reference ------------------------------
def ref_forward(x, P):
    g, b_, m, v = P["bn0_gamma"], P["bn0_beta"], P["bn0_rmean"], P["bn0_rvar"]
    xbn = (x - m[None, :, None]) / jnp.sqrt(v + EPS)[None, :, None] * g[None, :, None] \
        + b_[None, :, None]
    conv = jnp.einsum("bch,fh->bfc", xbn, P["conv_w"]) + P["conv_b"][None, :, None]
    h = conv.reshape(x.shape[0], -1)
    for lyr in P["hidden"]:
        h = (h - lyr["rmean"]) / jnp.sqrt(lyr["rvar"] + EPS) * lyr["gamma"] + lyr["beta"]
        h = h @ lyr["w"].T + lyr["b"]
        h = jnp.maximum(h, 0.0)
    h = (h - P["bnout_rmean"]) / jnp.sqrt(P["bnout_rvar"] + EPS) * P["bnout_gamma"] \
        + P["bnout_beta"]
    return h @ P["fcout_w"].T + P["fcout_b"]


# ----------------------------- Main --------------------------------------------
if __name__ == "__main__":
    B, C, H = 24, 16, 8           # batch, num_inputs, hist_bins (B=24 -> 2 grid steps)
    F = 4                         # conv_num_filts
    layer_sizes = [32, 32]        # layer_size_list
    O = 4                         # num_outputs
    # dropout_p = 0.0 (eval mode -> identity)

    keys = iter(jax.random.split(jax.random.PRNGKey(0), 64))

    def normal(shape, scale=1.0):
        return scale * jax.random.normal(next(keys), shape, dtype=jnp.float32)

    def uniform(shape, lo, hi):
        return jax.random.uniform(next(keys), shape, dtype=jnp.float32, minval=lo, maxval=hi)

    P = {
        "bn0_gamma": uniform((C,), 0.5, 1.5),
        "bn0_beta": normal((C,), 0.1),
        "bn0_rmean": normal((C,), 0.1),
        "bn0_rvar": uniform((C,), 0.5, 1.5),
        "conv_w": normal((F, H), 1.0 / np.sqrt(H)),
        "conv_b": normal((F,), 0.1),
        "hidden": [],
    }
    sizes = [C * F] + layer_sizes
    for prev, nxt in zip(sizes[:-1], sizes[1:]):
        P["hidden"].append({
            "gamma": uniform((prev,), 0.5, 1.5),
            "beta": normal((prev,), 0.1),
            "rmean": normal((prev,), 0.1),
            "rvar": uniform((prev,), 0.5, 1.5),
            "w": normal((nxt, prev), 1.0 / np.sqrt(prev)),
            "b": normal((nxt,), 0.1),
        })
    last = layer_sizes[-1]
    P["bnout_gamma"] = uniform((last,), 0.5, 1.5)
    P["bnout_beta"] = normal((last,), 0.1)
    P["bnout_rmean"] = normal((last,), 0.1)
    P["bnout_rvar"] = uniform((last,), 0.5, 1.5)
    P["fcout_w"] = normal((O, last), 1.0 / np.sqrt(last))
    P["fcout_b"] = normal((O,), 0.1)

    x = jax.random.normal(next(keys), (B, C, H), dtype=jnp.float32)

    out = tcn_forward(x, P)
    jax.block_until_ready(out)

    ref = ref_forward(x, P)
    assert out.shape == (B, O), out.shape
    # bf16 weights / bf16 MXU inputs with f32 accumulation -> ~1e-2 tolerance.
    assert np.allclose(np.asarray(out), np.asarray(ref), rtol=2e-2, atol=2e-2), \
        "Pallas output does not match reference"
    print("KERNEL_OK")
</pallas_src>

<mosaic_0001>
module attributes {stable_mosaic.version = 11 : i64} {
  func.func @kernel(%arg0: i32, %arg1: memref<16x128xf32, #tpu.memory_space<vmem>>, %arg2: memref<3x128x128xbf16, #tpu.memory_space<vmem>>, %arg3: memref<3x128xf32, #tpu.memory_space<vmem>>, %arg4: memref<16x128xf32, #tpu.memory_space<vmem>>) attributes {dimension_semantics = [#tpu.dimension_semantics<parallel>], iteration_bounds = array<i64: 2>, scalar_prefetch = 0 : i64, scratch_operands = 0 : i64, tpu.core_type = #tpu.core_type<tc>, window_params = [{transform_indices = @transform_0, window_bounds = array<i64: 16, 128>}, {pipeline_mode = #tpu.pipeline_mode<synchronous>, transform_indices = @transform_1, window_bounds = array<i64: 3, 128, 128>}, {pipeline_mode = #tpu.pipeline_mode<synchronous>, transform_indices = @transform_2, window_bounds = array<i64: 3, 128>}, {transform_indices = @transform_3, window_bounds = array<i64: 16, 128>}]} {
    %c0 = arith.constant 0 : index
    %c0_0 = arith.constant 0 : index
    %0 = vector.load %arg1[%c0, %c0_0] : memref<16x128xf32, #tpu.memory_space<vmem>>, vector<16x128xf32>
    %c0_1 = arith.constant 0 : index
    %c0_2 = arith.constant 0 : index
    %c0_3 = arith.constant 0 : index
    %1 = vector.load %arg2[%c0_1, %c0_2, %c0_3] : memref<3x128x128xbf16, #tpu.memory_space<vmem>>, vector<1x128x128xbf16>
    %2 = vector.shape_cast %1 : vector<1x128x128xbf16> to vector<128x128xbf16>
    %3 = arith.truncf %0 : vector<16x128xf32> to vector<16x128xbf16>
    %cst = arith.constant dense<0.000000e+00> : vector<16x128xf32>
    %4 = tpu.matmul %3, %2, %cst {dimension_numbers = #tpu.dot_dimension_numbers<[1], [0], [0], [1], [0, 0, 1, 1], [], []>} : vector<16x128xbf16>, vector<128x128xbf16>, vector<16x128xf32> -> vector<16x128xf32>
    %c0_4 = arith.constant 0 : index
    %c0_5 = arith.constant 0 : index
    %5 = vector.load %arg3[%c0_4, %c0_5] : memref<3x128xf32, #tpu.memory_space<vmem>>, vector<1x128xf32>
    %6 = vector.broadcast %5 : vector<1x128xf32> to vector<16x128xf32>
    %7 = arith.addf %4, %6 : vector<16x128xf32>
    %cst_6 = arith.constant 0.000000e+00 : f32
    %8 = vector.broadcast %cst_6 : f32 to vector<16x128xf32>
    %9 = arith.maximumf %7, %8 : vector<16x128xf32>
    %c1 = arith.constant 1 : index
    %c0_7 = arith.constant 0 : index
    %c0_8 = arith.constant 0 : index
    %10 = vector.load %arg2[%c1, %c0_7, %c0_8] : memref<3x128x128xbf16, #tpu.memory_space<vmem>>, vector<1x128x128xbf16>
    %11 = vector.shape_cast %10 : vector<1x128x128xbf16> to vector<128x128xbf16>
    %12 = arith.truncf %9 : vector<16x128xf32> to vector<16x128xbf16>
    %cst_9 = arith.constant dense<0.000000e+00> : vector<16x128xf32>
    %13 = tpu.matmul %12, %11, %cst_9 {dimension_numbers = #tpu.dot_dimension_numbers<[1], [0], [0], [1], [0, 0, 1, 1], [], []>} : vector<16x128xbf16>, vector<128x128xbf16>, vector<16x128xf32> -> vector<16x128xf32>
    %c1_10 = arith.constant 1 : index
    %c0_11 = arith.constant 0 : index
    %14 = vector.load %arg3[%c1_10, %c0_11] : memref<3x128xf32, #tpu.memory_space<vmem>>, vector<1x128xf32>
    %15 = vector.broadcast %14 : vector<1x128xf32> to vector<16x128xf32>
    %16 = arith.addf %13, %15 : vector<16x128xf32>
    %cst_12 = arith.constant 0.000000e+00 : f32
    %17 = vector.broadcast %cst_12 : f32 to vector<16x128xf32>
    %18 = arith.maximumf %16, %17 : vector<16x128xf32>
    %c2 = arith.constant 2 : index
    %c0_13 = arith.constant 0 : index
    %c0_14 = arith.constant 0 : index
    %19 = vector.load %arg2[%c2, %c0_13, %c0_14] : memref<3x128x128xbf16, #tpu.memory_space<vmem>>, vector<1x128x128xbf16>
    %20 = vector.shape_cast %19 : vector<1x128x128xbf16> to vector<128x128xbf16>
    %21 = arith.truncf %18 : vector<16x128xf32> to vector<16x128xbf16>
    %cst_15 = arith.constant dense<0.000000e+00> : vector<16x128xf32>
    %22 = tpu.matmul %21, %20, %cst_15 {dimension_numbers = #tpu.dot_dimension_numbers<[1], [0], [0], [1], [0, 0, 1, 1], [], []>} : vector<16x128xbf16>, vector<128x128xbf16>, vector<16x128xf32> -> vector<16x128xf32>
    %c2_16 = arith.constant 2 : index
    %c0_17 = arith.constant 0 : index
    %23 = vector.load %arg3[%c2_16, %c0_17] : memref<3x128xf32, #tpu.memory_space<vmem>>, vector<1x128xf32>
    %24 = vector.broadcast %23 : vector<1x128xf32> to vector<16x128xf32>
    %25 = arith.addf %22, %24 : vector<16x128xf32>
    %c0_18 = arith.constant 0 : index
    %c0_19 = arith.constant 0 : index
    %26 = vector.load %arg4[%c0_18, %c0_19] : memref<16x128xf32, #tpu.memory_space<vmem>>, vector<16x128xf32>
    tpu.vector_store %arg4[%c0_18, %c0_19], %25 {strides = array<i32>} : memref<16x128xf32, #tpu.memory_space<vmem>>, vector<16x128xf32>,
    return
  }
  func.func @transform_0(%arg0: i32) -> (i32, i32) {
    %c0_i32 = arith.constant 0 : i32
    %c0_i32_0 = arith.constant 0 : i32
    return %arg0, %c0_i32 : i32, i32
  }
  func.func @transform_1(%arg0: i32) -> (i32, i32, i32) {
    %c0_i32 = arith.constant 0 : i32
    %c0_i32_0 = arith.constant 0 : i32
    %c0_i32_1 = arith.constant 0 : i32
    %c0_i32_2 = arith.constant 0 : i32
    return %c0_i32, %c0_i32_0, %c0_i32_1 : i32, i32, i32
  }
  func.func @transform_2(%arg0: i32) -> (i32, i32) {
    %c0_i32 = arith.constant 0 : i32
    %c0_i32_0 = arith.constant 0 : i32
    %c0_i32_1 = arith.constant 0 : i32
    return %c0_i32, %c0_i32_0 : i32, i32
  }
  func.func @transform_3(%arg0: i32) -> (i32, i32) {
    %c0_i32 = arith.constant 0 : i32
    %c0_i32_0 = arith.constant 0 : i32
    return %arg0, %c0_i32 : i32, i32
  }
}

</mosaic_0001>

<bundles_post_ra>
// kernel: tpu_custom_call.1
= control target key start
LH: loop header
LB: loop body
LE: loop exit
PB: predicated region body
PF: predicated region fallthrough
CT: control target
= control target key end

     0   :  { %8 = vsyncpa [#allocation3], 0  ;;  %s1309_s0 = inlined_call_operand.hbm [shape: f32[32,128], index: 0, kind: input, shape index: {}]   ;;  %s1310_s1 = inlined_call_operand.hbm [shape: bf16[3,128,128], index: 1, kind: input, shape index: {}]   ;;  %s1311_s2 = inlined_call_operand.hbm [shape: f32[3,128], index: 2, kind: input, shape index: {}]   ;;  %s1312_s3 = inlined_call_operand.hbm [shape: f32[32,128], index: 3, kind: output, shape index: {}]  }
   0x1   :  { %10 = vsyncpa [#allocation3 + $0x1], 0 }
   0x2   :  { %11 = vsyncpa [#allocation6], 0 }
   0x3   :  { %12 = vsyncpa [#allocation4], 0 }
   0x4   :  { %14 = vsyncpa [#allocation4 + $0x1], 0  ;;  %s1083_s12 = smov 0   ;;  %s1085_s13 = smov 0  }
   0x5   :  { %s1087_s14 = smov 0   ;;  %s1089_s15 = smov 0  }
   0x6 LB: > { %s1104_s16 = sadd.s32 4294967295, %s1049_s15   ;;  %s668_s17 = sadd.s32 4294967294, %s1049_s15   ;;  %s1049_s15 = sphi %s1089_s15, %s1334_s15   ;;  %s1045_s14 = sphi %s1087_s14, %s1333_s14   ;;  %s1041_s13 = sphi %s1085_s13, %s1332_s13   ;;  %s1037_s12 = sphi %s1083_s12, %s1331_s12  }
   0x7   : > { %p40_p0 = scmp.ne.s32.totalorder %s1041_s13, %s1037_s12  ;;  %p1313_p1 = scmp.eq.s32.totalorder %s1104_s16, 0 }
   0x8   : > { %p112_p3 = scmp.eq.s32.totalorder %s668_s17, 1  ;;  %p669_p5 = scmp.ge.s32.totalorder %s1049_s15, 1 }
   0x9   : > { %p1113_p4 = por %p1313_p1, %p40_p0  ;;  %p119_p7 = scmp.lt.s32.totalorder %s1049_s15, 3 }
   0xa   : > { %p1118_p6 = por %p112_p3, %p40_p0  ;;  %s1051_s21 = smov [#allocation5]  }
   0xb   : > { %s1317_s18 = scalar_select %p1113_p4, 1, 0 }
   0xc   : > { %s1318_s19 = scalar_select %p1118_p6, 1, 0 }
   0xd   : > { %p1123_p8 = pnand %p669_p5, %p119_p7  ;;  %s131_s22 = sshll.u32 %s1051_s21, 4  ;;  %s132_s22 = int_to_ptr.vmem [resolvable:$true] %s131_s22 }
   0xe   : > { %s1052_s24 = smov [#allocation7]   ;;  %s912_s26 = scalar_lea.vmem %s132_s22, 3072 }
   0xf   : > { %s1319_s20 = scalar_select %p1123_p8, 1, 0 }
  0x10   : > { %p814_p9 = pneg %p1123_p8  ;;  %s145_s25 = sshll.u32 %s1052_s24, 4  ;;  %s146_s25 = int_to_ptr.vmem [resolvable:$true] %s145_s25 }
  0x11   : > { %p913_p13 = scmp.ne.s32.totalorder %s132_s22, %s912_s26  ;;  %p920_p5 = scmp.lt.s32.totalorder %s132_s22, %s132_s22 }
  0x12   : > { %p1132_p11 = pnand %p814_p9, %p1313_p1  ;;  %p921_p7 = scmp.lt.s32.totalorder %s912_s26, %s912_s26 }
  0x14   : > { %p903_p12 = pneg %p1132_p11  ;;  %p922_p10 = por %p921_p7, %p920_p5 }
  0x16   : > { %p915_p0 = pnand %p913_p13, %p903_p12 }
  0x18   : > { %p916_p3 = pneg %p915_p0 }
  0x1a   : > { %p923_p9 = pnand %p922_p10, %p916_p3 }
  0x1c   : > { %926 = shalt.err (!%p923_p9)
}
  0x1d   : > { %s1053_s27 = smov 64   ;;  %s1054_s28 = smov 4  }
  0x1e   : > { %817 = dma.hbm_to_vmem [thread:$0]  (!%p1132_p11), %s1310_s1, 3072, %s132_s22, [#allocation6], %s1053_s27, %s1053_s27, %s1054_s28  }
  0x1f   : > { %s938_s4 = scalar_lea.vmem %s146_s25, 64  ;;  %p946_p2 = scmp.lt.s32.totalorder %s146_s25, %s146_s25 }
  0x20   : > { %p939_p1 = scmp.ne.s32.totalorder %s146_s25, %s938_s4  ;;  %p947_p6 = scmp.lt.s32.totalorder %s938_s4, %s938_s4 }
  0x22   : > { %p941_p13 = pnand %p939_p1, %p903_p12  ;;  %p948_p5 = por %p947_p6, %p946_p2 }
  0x24   : > { %p942_p0 = pneg %p941_p13 }
  0x26   : > { %p949_p10 = pnand %p948_p5, %p942_p0 }
  0x28   : > { %952 = shalt.err (!%p949_p10)
}
  0x29   : > { %820 = dma.hbm_to_vmem [thread:$0]  (!%p1132_p11), %s1311_s2, 64, %s146_s25, [#allocation6]  }
  0x2a   : > { %s1155_s7 = sadd.s32 1, %s1049_s15   ;;  %s27_s8 = sadd.s32 1, %s1045_s14 }
  0x2b   : > { %s24_s9 = ssub.s32 %s1049_s15, %s1155_s7  ;;  %p34_p1 = scmp.ne.s32.totalorder %s1045_s14, %s1041_s13 }
  0x2c   : > { %p25_p2 = scmp.eq.s32.totalorder %s24_s9, 0  ;;  %p35_p6 = scmp.eq.s32.totalorder %s1049_s15, 0 }
  0x2d   : > { %p1321_p12 = scmp.eq.s32.totalorder %s1104_s16, 1  ;;  %p831_p7 = scmp.lt.s32.totalorder %s1049_s15, 2 }
  0x2e   : > { %s1171_s11 = scalar_select %p25_p2, %s1045_s14, %s27_s8  }
  0x2f   : > { %p1165_p3 = por %p1321_p12, %p34_p1  ;;  %p36_p9 = por %p35_p6, %p34_p1 }
  0x30   : > { %s156_s17 = sand.u32 1, %s1045_s14   ;;  %s713_s22 = sshll.u32 %s1049_s15, 8 }
  0x31   : > { %s1322_s10 = scalar_select %p1165_p3, 1, 0 }
  0x32   : > { %s673_s21 = sshll.u32 %s156_s17, 4  ;;  %s1178_s25 = scalar_lea.hbm %s1309_s0, %s713_s22 }
  0x33   : > { %s160_s26 = scalar_lea.vmem [#allocation2], %s673_s21  ;;  %p1182_p11 = pnand %p831_p7, %p36_p9 }
  0x34   : > { %s167_s27 = sshll.u32 %s160_s26, 4  ;;  %s1186_s29 = scalar_lea.sflag [#allocation3], %s156_s17  ;;  %s1180_s27 = int_to_ptr.vmem [resolvable:$true] %s167_s27 }
  0x35   : > { %s953_s30 = scalar_lea.hbm %s1178_s25, 256  ;;  %p955_p0 = pneg %p1182_p11 }
  0x36   : > { %p954_p13 = scmp.ne.s32.totalorder %s1178_s25, %s953_s30  ;;  %s958_s6 = scalar_lea.hbm %s1309_s0, 512 }
  0x37   : > { %p959_p1 = scmp.lt.s32.totalorder %s1178_s25, %s1309_s0  ;;  %p960_p2 = scmp.lt.s32.totalorder %s958_s6, %s953_s30 }
  0x38   : > { %p956_p5 = pnand %p955_p0, %p954_p13 }
  0x39   : > { %p961_p6 = por %p960_p2, %p959_p1 }
  0x3a   : > { %p957_p10 = pneg %p956_p5 }
  0x3c   : > { %p962_p12 = pnand %p961_p6, %p957_p10 }
  0x3e   : > { %965 = shalt.err (!%p962_p12)
}
  0x3f   : > { %s966_s17 = scalar_lea.vmem %s1180_s27, 256  ;;  %s1055_s21 = smov [#allocation2]  }
  0x40   : > { %p967_p7 = scmp.ne.s32.totalorder %s1180_s27, %s966_s17  ;;  %s971_s22 = sshll.u32 %s1055_s21, 4  ;;  %s972_s22 = int_to_ptr.vmem [resolvable:$false] %s971_s22 }
  0x41   : > { %s973_s23 = scalar_lea.vmem %s972_s22, 512  ;;  %p974_p5 = scmp.lt.s32.totalorder %s1180_s27, %s972_s22 }
  0x42   : > { %p969_p9 = pnand %p967_p7, %p955_p0  ;;  %p975_p3 = scmp.lt.s32.totalorder %s973_s23, %s966_s17 }
  0x44   : > { %p970_p13 = pneg %p969_p9  ;;  %p976_p4 = por %p975_p3, %p974_p5 }
  0x46   : > { %p977_p8 = pnand %p976_p4, %p970_p13 }
  0x48   : > { %980 = shalt.err (!%p977_p8)
}
  0x49   : > { %s1056_s24 = smov 128   ;;  %s1057_s26 = smov 8  }
  0x4a   : > { %824 = dma.hbm_to_vmem [thread:$0]  (!%p1182_p11), %s1178_s25, 256, %s1180_s27, %s1186_s29, %s1056_s24, %s1056_s24, %s1057_s26  }
  0x4b   : > { %p1324_p0 = scmp.ne.s32.totalorder %s1319_s20, 0 }
  0x4c   : > { %s1210_s30 = sand.u32 (!%p1324_p0), 1, %s1041_s13   ;;  %p1325_p4 = scmp.ne.s32.totalorder (!%p1324_p0), %s1317_s18, 0 }
  0x4d   : > { %179 = sbr.rel (%p1324_p0) target bundleno = 739 (0x2e3), region = 32  ;;  %s677_s4 = sshll.u32 (!%p1324_p0), %s1210_s30, 4 }
  0x4e   : > { %s182_s5 = scalar_lea.sflag (!%p1324_p0), [#allocation3], %s1210_s30  ;;  %s1216_s6 = scalar_lea.vmem (!%p1324_p0), [#allocation2], %s677_s4 }
  0x52   : > { %1024 = dma.done.wait (%p1325_p4), %s182_s5, 256  }
  0x53   : > { %1026 = vsyncadd (%p1325_p4), %s182_s5, 4294967040  ;;  %p1326_p8 = scmp.eq.s32.totalorder %s1104_s16, 0 }
  0x55   : > { %1028 = dma.done.wait (%p1326_p8), [#allocation6], 3136   ;;  %p1327_p3 = pmov %p1326_p8 }
  0x56   : > { %v1058_v0 = vmov 0.0   ;;  %vm1059_vm0 = vmmov 0   ;;  %v877_v1 = vld [vmem:[#allocation5 + $0x38] sm:$0xff]   ;;  %v878_v2 = vld [vmem:[#allocation5 + $0x30] sm:$0xff]   ;;  %v879_v3 = vld [vmem:[#allocation5 + $0x28] sm:$0xff]   ;;  %s215_s18 = scalar_lea.vmem [#allocation8], %s677_s4 }
  0x57   : > { %1030 = vsyncadd (%p1327_p3), [#allocation6], 4294964160  ;;  %742 = vmatprep.subr.bf16.mxu0 %v1058_v0  ;;  %758 = vmatprep.mubr.msk.bf16.mxu0 %vm1059_vm0, %v1058_v0  ;;  %v885_v4 = vld [vmem:[#allocation5 + $0x78] sm:$0xff]   ;;  %v880_v5 = vld [vmem:[#allocation5 + $0x20] sm:$0xff]   ;;  %s576_s20 = sshll.u32 %s215_s18, 4  ;;  %s714_s25 = sshll.u32 %s1104_s16, 8  ;;  %s1261_s20 = int_to_ptr.vmem [resolvable:$true] %s576_s20 }
  0x58   : > { %762 = vmatprep.subr.bf16.mxu1 %v1058_v0  ;;  %778 = vmatprep.mubr.msk.bf16.mxu1 %vm1059_vm0, %v1058_v0  ;;  %v886_v6 = vld [vmem:[#allocation5 + $0x70] sm:$0xff]   ;;  %v881_v7 = vld [vmem:[#allocation5 + $0x18] sm:$0xff]   ;;  %v887_v8 = vld [vmem:[#allocation5 + $0x68] sm:$0xff]   ;;  %s1266_s29 = scalar_lea.hbm %s1312_s3, %s714_s25  ;;  %s563_s8 = scalar_lea.sflag [#allocation4], %s1210_s30 }
  0x59   : > { %743 = vmatpush3.bf16.msra.mxu0 %v877_v1  ;;  %763 = vmatpush3.bf16.msra.mxu1 %v885_v4  ;;  %v882_v9 = vld [vmem:[#allocation5 + $0x10] sm:$0xff]   ;;  %v888_v10 = vld [vmem:[#allocation5 + $0x60] sm:$0xff]   ;;  %v883_v11 = vld [vmem:[#allocation5 + $0x8] sm:$0xff]   ;;  %s981_s9 = scalar_lea.vmem %s1261_s20, 256  ;;  %p1328_p10 = scmp.ne.s32.totalorder %s1322_s10, 0 }
  0x5a   : > { %744 = vmatprep.subr.bf16.mxu0 %v1058_v0  ;;  %764 = vmatprep.subr.bf16.mxu1 %v1058_v0  ;;  %v889_v12 = vld [vmem:[#allocation5 + $0x58] sm:$0xff]   ;;  %v884_v13 = vld [vmem:[#allocation5] sm:$0xff]   ;;  %v890_v17 = vld [vmem:[#allocation5 + $0x50] sm:$0xff]   ;;  %p982_p11 = scmp.ne.s32.totalorder %s1261_s20, %s981_s9  ;;  %s1060_s16 = smov [#allocation8]  }
  0x5b   : > { %v219_v14 = vld [vmem:[%s1216_s6] sm:$0xff]  ;;  %v220_v15 = vld [vmem:[%s1216_s6 + $0x8] sm:$0xff]  ;;  %s985_s17 = sshll.u32 %s1060_s16, 4  ;;  %s986_s17 = int_to_ptr.vmem [resolvable:$false] %s985_s17 }
  0x5c   : > { %v237_v16 = vpack.c.bf16 %v220_v15, %v219_v14  ;;  %v891_v18 = vld [vmem:[#allocation5 + $0x48] sm:$0xff]   ;;  %v892_v19 = vld [vmem:[#allocation5 + $0x40] sm:$0xff]   ;;  %v893_v20 = vld [vmem:[#allocation5 + $0xb8] sm:$0xff]   ;;  %p983_p1 = pnand %p982_p11, %p1328_p10  ;;  %s987_s21 = scalar_lea.vmem %s986_s17, 512 }
  0x5d   : > { %745 = vmatpush3.bf16.msra.mxu0 %v878_v2  ;;  %765 = vmatpush3.bf16.msra.mxu1 %v886_v6  ;;  %v894_v21 = vld [vmem:[#allocation5 + $0xb0] sm:$0xff]   ;;  %v895_v22 = vld [vmem:[#allocation5 + $0xa8] sm:$0xff]   ;;  %v896_v23 = vld [vmem:[#allocation5 + $0xa0] sm:$0xff]   ;;  %p988_p6 = scmp.lt.s32.totalorder %s1261_s20, %s986_s17  ;;  %p989_p12 = scmp.lt.s32.totalorder %s987_s21, %s981_s9 }
  0x5e   : > { %746 = vmatprep.subr.bf16.mxu0 %v1058_v0  ;;  %766 = vmatprep.subr.bf16.mxu1 %v1058_v0  ;;  %v897_v24 = vld [vmem:[#allocation5 + $0x98] sm:$0xff]   ;;  %v681_v25 = vld [vmem:[#allocation7] ss:$0 sm:$0xff]  ;;  %v898_v35 = vld [vmem:[#allocation5 + $0x90] sm:$0xff]   ;;  %p984_p2 = pneg %p983_p1 }
  0x5f   : > { %v899_v36 = vld [vmem:[#allocation5 + $0x88] sm:$0xff]   ;;  %v900_v37 = vld [vmem:[#allocation5 + $0x80] sm:$0xff]   ;;  %p990_p7 = por %p989_p12, %p988_p6 }
  0x60   : > { %v690_v38 = vld [vmem:[#allocation7 + $0x1] ss:$0 sm:$0xff]  ;;  %v699_v48 = vld [vmem:[#allocation7 + $0x2] ss:$0 sm:$0xff] }
  0x61   : > { %747 = vmatpush3.bf16.msra.mxu0 %v879_v3  ;;  %767 = vmatpush3.bf16.msra.mxu1 %v887_v8  ;;  %p991_p9 = pnand %p990_p7, %p984_p2 }
  0x62   : > { %748 = vmatprep.subr.bf16.mxu0 %v1058_v0  ;;  %768 = vmatprep.subr.bf16.mxu1 %v1058_v0 }
  0x65   : > { %749 = vmatpush3.bf16.msra.mxu0 %v880_v5  ;;  %769 = vmatpush3.bf16.msra.mxu1 %v888_v10 }
  0x66   : > { %750 = vmatprep.subr.bf16.mxu0 %v1058_v0  ;;  %770 = vmatprep.subr.bf16.mxu1 %v1058_v0 }
  0x69   : > { %751 = vmatpush3.bf16.msra.mxu0 %v881_v7  ;;  %771 = vmatpush3.bf16.msra.mxu1 %v889_v12 }
  0x6a   : > { %752 = vmatprep.subr.bf16.mxu0 %v1058_v0  ;;  %772 = vmatprep.subr.bf16.mxu1 %v1058_v0 }
  0x6d   : > { %753 = vmatpush3.bf16.msra.mxu0 %v882_v9  ;;  %773 = vmatpush3.bf16.msra.mxu1 %v890_v17 }
  0x6e   : > { %754 = vmatprep.subr.bf16.mxu0 %v1058_v0  ;;  %774 = vmatprep.subr.bf16.mxu1 %v1058_v0 }
  0x71   : > { %755 = vmatpush3.bf16.msra.mxu0 %v883_v11  ;;  %775 = vmatpush3.bf16.msra.mxu1 %v891_v18 }
  0x72   : > { %756 = vmatprep.subr.bf16.mxu0 %v1058_v0  ;;  %776 = vmatprep.subr.bf16.mxu1 %v1058_v0 }
  0x75   : > { %757 = vmatpush3.bf16.msra.mxu0 %v884_v13  ;;  %777 = vmatpush3.bf16.msra.mxu1 %v892_v19 }
  0x76   : > { %782 = vmatprep.subr.bf16.mxu0 %v1058_v0 }
  0x78   : > { %759 = vmatmul.mubr.bf16.vlgmr.msra.gmra.mxu0 %v237_v16 }
  0x79   : > { %798 = vmatprep.mubr.msk.bf16.mxu0 %vm1059_vm0, %v1058_v0  ;;  %783 = vmatpush3.bf16.msra.mxu0 %v893_v20 }
  0x7a   : > { %784 = vmatprep.subr.bf16.mxu0 %v1058_v0 }
  0x7d   : > { %785 = vmatpush3.bf16.msra.mxu0 %v894_v21 }
  0x7e   : > { %786 = vmatprep.subr.bf16.mxu0 %v1058_v0 }
  0x81   : > { %787 = vmatpush3.bf16.msra.mxu0 %v895_v22 }
  0x82   : > { %788 = vmatprep.subr.bf16.mxu0 %v1058_v0 }
  0x85   : > { %789 = vmatpush3.bf16.msra.mxu0 %v896_v23 }
  0x86   : > { %790 = vmatprep.subr.bf16.mxu0 %v1058_v0 }
  0x89   : > { %791 = vmatpush3.bf16.msra.mxu0 %v897_v24 }
  0x8a   : > { %792 = vmatprep.subr.bf16.mxu0 %v1058_v0 }
  0x8d   : > { %793 = vmatpush3.bf16.msra.mxu0 %v898_v35 }
  0x8e   : > { %794 = vmatprep.subr.bf16.mxu0 %v1058_v0 }
  0x91   : > { %795 = vmatpush3.bf16.msra.mxu0 %v899_v36 }
  0x92   : > { %796 = vmatprep.subr.bf16.mxu0 %v1058_v0 }
  0x95   : > { %797 = vmatpush3.bf16.msra.mxu0 %v900_v37 }
 0x138   : > { %v325_v26 = vpop.f32.mrf.mxu0 }
 0x139   : > { %v326_v28 = vadd.f32 %v681_v25, %v325_v26 }
 0x13a   : > { %v760_v27 = vpop.f32.mrf.mxu0 }
 0x13b   : > { %v332_v32 = vmax.f32 %v326_v28, 0.0 }
 0x13c   : > { %v328_v29 = vpop.f32.mrf.mxu0 }
 0x13d   : > { %v329_v30 = vadd.f32 %v681_v25, %v328_v29 }
 0x13e   : > { %v761_v31 = vpop.f32.mrf.mxu0 }
 0x13f   : > { %v333_v33 = vmax.f32 %v329_v30, 0.0 }
 0x141   : > { %v351_v34 = vpack.c.bf16 %v333_v33, %v332_v32 }
 0x143   : > { %779 = vmatmul.mubr.bf16.vlgmr.msra.gmra.mxu1 %v351_v34 }
 0x203   : > { %v439_v39 = vpop.f32.mrf.mxu1 }
 0x204   : > { %v440_v41 = vadd.f32 %v690_v38, %v439_v39 }
 0x205   : > { %v780_v40 = vpop.f32.mrf.mxu1 }
 0x206   : > { %v446_v45 = vmax.f32 %v440_v41, 0.0 }
 0x207   : > { %v442_v42 = vpop.f32.mrf.mxu1 }
 0x208   : > { %v443_v43 = vadd.f32 %v690_v38, %v442_v42 }
 0x209   : > { %v781_v44 = vpop.f32.mrf.mxu1 }
 0x20a   : > { %v447_v46 = vmax.f32 %v443_v43, 0.0 }
 0x20c   : > { %v465_v47 = vpack.c.bf16 %v447_v46, %v446_v45 }
 0x20e   : > { %799 = vmatmul.mubr.bf16.vlgmr.msra.gmra.mxu0 %v465_v47 }
 0x2ce   : > { %v553_v49 = vpop.f32.mrf.mxu0 }
 0x2cf   : > { %v554_v50 = vadd.f32 %v699_v48, %v553_v49 }
 0x2d0   : > { %v800_v51 = vpop.f32.mrf.mxu0 }
 0x2d1   : > { %560 = vst [vmem:[%s215_s18] sm:$0xff] %v554_v50 }
 0x2d2   : > { %v556_v52 = vpop.f32.mrf.mxu0 }
 0x2d3   : > { %v557_v53 = vadd.f32 %v699_v48, %v556_v52 }
 0x2d4   : > { %v801_v54 = vpop.f32.mrf.mxu0 }
 0x2d5   : > { %561 = vst [vmem:[%s215_s18 + $0x8] sm:$0xff] %v557_v53 }
 0x2d6   : > { %994 = shalt.err (!%p991_p9)
}
 0x2d7   : > { %s995_s22 = scalar_lea.hbm %s1266_s29, 256  ;;  %s999_s26 = scalar_lea.hbm %s1312_s3, 512 }
 0x2d8   : > { %p996_p13 = scmp.ne.s32.totalorder %s1266_s29, %s995_s22  ;;  %p1000_p4 = scmp.lt.s32.totalorder %s1266_s29, %s1312_s3 }
 0x2d9   : > { %p1001_p8 = scmp.lt.s32.totalorder %s999_s26, %s995_s22 }
 0x2da   : > { %p997_p5 = pnand %p996_p13, %p1328_p10 }
 0x2db   : > { %p1002_p3 = por %p1001_p8, %p1000_p4 }
 0x2dc   : > { %p998_p0 = pneg %p997_p5 }
 0x2de   : > { %p1003_p11 = pnand %p1002_p3, %p998_p0 }
 0x2e0   : > { %1006 = shalt.err (!%p1003_p11)
}
 0x2e1   : > { %s1061_s6 = smov 128   ;;  %s1062_s18 = smov 8  }
 0x2e2   : > { %812 = dma.vmem_to_hbm [thread:$0]  (%p1328_p10), %s1261_s20, 256, %s1266_s29, %s563_s8, %s1061_s6, %s1061_s6, %s1062_s18  }
 0x2e3 PF: > { %s591_s25 = sand.u32 1, %s1037_s12   ;;  %p1329_p1 = scmp.ne.s32.totalorder %s1318_s19, 0 }
 0x2e4   : > { %p1330_p2 = scmp.ge.s32.totalorder %s1049_s15, 2  ;;  %s592_s27 = scalar_lea.sflag [#allocation4], %s591_s25 }
 0x2e6   : > { %p826_p6 = pnand %p1330_p2, %p1329_p1 }
 0x2e8   : > { %p827_p12 = pneg %p826_p6 }
 0x2ea   : > { %1032 = dma.done.wait (%p827_p12), %s592_s27, 256  }
 0x2eb   : > { %1034 = vsyncadd (%p827_p12), %s592_s27, 4294967040  ;;  %p17_p7 = scmp.ge.s32.totalorder %s1155_s7, 4   ;;  %s1331_s12 = smov %s1041_s13 }
 0x2ec   : > { %s1332_s13 = smov %s1045_s14  ;;  %s1333_s14 = smov %s1171_s11 }
 0x2ed   : > { %s1334_s15 = smov %s1155_s7  ;;  %19 = sbr.rel (!%p17_p7) target bundleno = 6 (0x6), region = 87 }
 0x2f2   :  { %597 = vsyncpa [#allocation3], 1 }
 0x2f3   :  { %599 = vsyncpa [#allocation3 + $0x1], 1 }
 0x2f4   :  { %600 = vsyncpa [#allocation6], 1 }
 0x2f5   :  { %601 = vsyncpa [#allocation4], 1 }
 0x2f6   :  { %603 = vsyncpa [#allocation4 + $0x1], 1 }

</bundles_post_ra>
